<compile_context>
chip_gen: v5e
topology: v5e:2x2
jax: 0.10.0
libtpu: 0.0.40
codegen_flags: <defaults>
</compile_context>

<pallas_src>
import jax
import jax.numpy as jnp
from jax.experimental import pallas as pl
from jax.experimental.pallas import tpu as pltpu


def decoder_deconv_kernel(w1_ref, b1_ref, w2_ref, b2_ref, zt_ref, out_ref):
    # zt_ref : (Z,   TB)  -- z block; sequence on sublanes, batch on lanes
    # out_ref: (Z+4, TB)  -- loc_img block (transposed; wrapper untransposes)
    Zp4, TB = out_ref.shape
    Z = Zp4 - 4

    w10 = w1_ref[0]; w11 = w1_ref[1]; w12 = w1_ref[2]; b1 = b1_ref[0]
    w20 = w2_ref[0]; w21 = w2_ref[1]; w22 = w2_ref[2]; b2 = b2_ref[0]

    x = zt_ref[...]                                       # (Z, TB)
    zero2 = jnp.zeros((2, TB), x.dtype)

    # --- ConvTranspose1d #1 (full conv along the sublane axis) + softplus ---
    # xp[i] == x[i-2], zero outside [0, Z).
    xp = jnp.concatenate([zero2, x, zero2], axis=0)       # (Z+4, TB)
    # h[j] = w1[0]*x[j] + w1[1]*x[j-1] + w1[2]*x[j-2] + b1,  j in [0, Z+2)
    h = (w10 * xp[2:Z + 4]
         + w11 * xp[1:Z + 3]
         + w12 * xp[0:Z + 2]
         + b1)                                            # (Z+2, TB)
    hidden = jnp.logaddexp(h, 0.0)                        # softplus (EUP), safe

    # --- ConvTranspose1d #2, kept entirely in vregs (no VMEM scratch) -------
    hp = jnp.concatenate([zero2, hidden, zero2], axis=0)  # (Z+6, TB)
    out = (w20 * hp[2:Z + 6]
           + w21 * hp[1:Z + 5]
           + w22 * hp[0:Z + 4]
           + b2)                                          # (Z+4, TB)
    out_ref[...] = out.astype(out_ref.dtype)


def decoder_deconv(z, w1, b1, w2, b2, *, max_lane_block=2048):
    """z: (B, Z) float32 -> (B, Z+4) float32 (PyTorch DecoderDeconv.forward)."""
    B, Z = z.shape
    zt = jnp.transpose(z)                # (Z, B): batch on the lane axis

    # Lane (batch) block: largest multiple of 128 dividing B (capped), else B.
    if B % 128 == 0:
        tb = 128
        while tb * 2 <= min(B, max_lane_block) and B % (tb * 2) == 0:
            tb *= 2
    else:
        tb = B
    grid = (B // tb,)

    smem = pltpu.MemorySpace.SMEM
    out_t = pl.pallas_call(
        decoder_deconv_kernel,
        out_shape=jax.ShapeDtypeStruct((Z + 4, B), z.dtype),
        grid=grid,
        in_specs=[
            pl.BlockSpec(memory_space=smem),             # w1 (3,)
            pl.BlockSpec(memory_space=smem),             # b1 (1,)
            pl.BlockSpec(memory_space=smem),             # w2 (3,)
            pl.BlockSpec(memory_space=smem),             # b2 (1,)
            pl.BlockSpec((Z, tb), lambda i: (0, i)),     # z block, lane-dense
        ],
        out_specs=pl.BlockSpec((Z + 4, tb), lambda i: (0, i)),
        compiler_params=pltpu.CompilerParams(
            dimension_semantics=("parallel",)),          # megacore split on v7x
    )(w1, b1, w2, b2, zt)
    return jnp.transpose(out_t)          # back to (B, Z+4)


def decoder_deconv_ref(z, w1, b1, w2, b2):
    """Pure-JAX reference (full convolution == ConvTranspose1d with 1 channel)."""
    conv_full = lambda w: jax.vmap(lambda row: jnp.convolve(row, w, mode="full"))
    h = jax.nn.softplus(conv_full(w1)(z) + b1[0])
    return conv_full(w2)(h) + b2[0]


if __name__ == "__main__":
    key = jax.random.PRNGKey(0)
    B, Z = 2, 8  # batch=2, z_dim=8 (hidden_dim / output_dim unused by the module)
    k1, k2, k3, k4, k5 = jax.random.split(key, 5)

    z = jax.random.normal(k1, (B, Z), jnp.float32)
    # Deterministic synthetic params (ConvTranspose1d(1,1,3): weight (1,1,3), bias (1,))
    w1 = 0.5 * jax.random.normal(k2, (3,), jnp.float32)
    b1 = 0.1 * jax.random.normal(k3, (1,), jnp.float32)
    w2 = 0.5 * jax.random.normal(k4, (3,), jnp.float32)
    b2 = 0.1 * jax.random.normal(k5, (1,), jnp.float32)

    out = decoder_deconv(z, w1, b1, w2, b2)
    jax.block_until_ready(out)
    ref = decoder_deconv_ref(z, w1, b1, w2, b2)
    assert out.shape == (B, Z + 4), out.shape
    assert jnp.allclose(out, ref, atol=1e-5, rtol=1e-5), (out, ref)

    # Exercise the gridded / lane-blocked path (tb=128, grid=(2,)).
    B2 = 256
    z2 = jax.random.normal(jax.random.PRNGKey(1), (B2, Z), jnp.float32)
    out2 = decoder_deconv(z2, w1, b1, w2, b2, max_lane_block=128)
    jax.block_until_ready(out2)
    ref2 = decoder_deconv_ref(z2, w1, b1, w2, b2)
    assert out2.shape == (B2, Z + 4), out2.shape
    assert jnp.allclose(out2, ref2, atol=1e-5, rtol=1e-5)

    print("KERNEL_OK")
</pallas_src>

<mosaic_0001>
module attributes {stable_mosaic.version = 11 : i64} {
  func.func @decoder_deconv_kernel(%arg0: i32, %arg1: memref<3xf32, #tpu.memory_space<smem>>, %arg2: memref<1xf32, #tpu.memory_space<smem>>, %arg3: memref<3xf32, #tpu.memory_space<smem>>, %arg4: memref<1xf32, #tpu.memory_space<smem>>, %arg5: memref<8x2xf32, #tpu.memory_space<vmem>>, %arg6: memref<12x2xf32, #tpu.memory_space<vmem>>) attributes {dimension_semantics = [#tpu.dimension_semantics<parallel>], iteration_bounds = array<i64: 1>, scalar_prefetch = 0 : i64, scratch_operands = 0 : i64, tpu.core_type = #tpu.core_type<tc>, window_params = [{transform_indices = @transform_0, window_bounds = array<i64: 3>}, {transform_indices = @transform_1, window_bounds = array<i64: 1>}, {transform_indices = @transform_2, window_bounds = array<i64: 3>}, {transform_indices = @transform_3, window_bounds = array<i64: 1>}, {transform_indices = @transform_4, window_bounds = array<i64: 8, 2>}, {transform_indices = @transform_5, window_bounds = array<i64: 12, 2>}]} {
    %c0 = arith.constant 0 : index
    %0 = memref.load %arg1[%c0] : memref<3xf32, #tpu.memory_space<smem>>
    %c1 = arith.constant 1 : index
    %1 = memref.load %arg1[%c1] : memref<3xf32, #tpu.memory_space<smem>>
    %c2 = arith.constant 2 : index
    %2 = memref.load %arg1[%c2] : memref<3xf32, #tpu.memory_space<smem>>
    %c0_0 = arith.constant 0 : index
    %3 = memref.load %arg2[%c0_0] : memref<1xf32, #tpu.memory_space<smem>>
    %c0_1 = arith.constant 0 : index
    %4 = memref.load %arg3[%c0_1] : memref<3xf32, #tpu.memory_space<smem>>
    %c1_2 = arith.constant 1 : index
    %5 = memref.load %arg3[%c1_2] : memref<3xf32, #tpu.memory_space<smem>>
    %c2_3 = arith.constant 2 : index
    %6 = memref.load %arg3[%c2_3] : memref<3xf32, #tpu.memory_space<smem>>
    %c0_4 = arith.constant 0 : index
    %7 = memref.load %arg4[%c0_4] : memref<1xf32, #tpu.memory_space<smem>>
    %c0_5 = arith.constant 0 : index
    %c0_6 = arith.constant 0 : index
    %8 = vector.load %arg5[%c0_5, %c0_6] : memref<8x2xf32, #tpu.memory_space<vmem>>, vector<8x2xf32>
    %cst = arith.constant 0.000000e+00 : f32
    %9 = vector.broadcast %cst : f32 to vector<2x2xf32>
    %10 = tpu.concatenate %9, %8, %9 in 0 : vector<2x2xf32>, vector<8x2xf32>, vector<2x2xf32> -> vector<12x2xf32>
    %11 = vector.extract_strided_slice %10 {offsets = [2, 0], sizes = [10, 2], strides = [1, 1]} : vector<12x2xf32> to vector<10x2xf32>
    %12 = vector.broadcast %0 : f32 to vector<10x2xf32>
    %13 = arith.mulf %12, %11 : vector<10x2xf32>
    %14 = vector.extract_strided_slice %10 {offsets = [1, 0], sizes = [10, 2], strides = [1, 1]} : vector<12x2xf32> to vector<10x2xf32>
    %15 = vector.broadcast %1 : f32 to vector<10x2xf32>
    %16 = arith.mulf %15, %14 : vector<10x2xf32>
    %17 = arith.addf %13, %16 : vector<10x2xf32>
    %18 = vector.extract_strided_slice %10 {offsets = [0, 0], sizes = [10, 2], strides = [1, 1]} : vector<12x2xf32> to vector<10x2xf32>
    %19 = vector.broadcast %2 : f32 to vector<10x2xf32>
    %20 = arith.mulf %19, %18 : vector<10x2xf32>
    %21 = arith.addf %17, %20 : vector<10x2xf32>
    %22 = vector.broadcast %3 : f32 to vector<10x2xf32>
    %23 = arith.addf %21, %22 : vector<10x2xf32>
    %cst_7 = arith.constant 0.000000e+00 : f32
    %24 = vector.broadcast %cst_7 : f32 to vector<10x2xf32>
    %25 = arith.maximumf %23, %24 : vector<10x2xf32>
    %26 = vector.broadcast %cst_7 : f32 to vector<10x2xf32>
    %27 = arith.subf %23, %26 : vector<10x2xf32>
    %28 = arith.cmpf one, %27, %27 : vector<10x2xf32>
    %29 = vector.broadcast %cst_7 : f32 to vector<10x2xf32>
    %30 = arith.addf %23, %29 : vector<10x2xf32>
    %31 = math.absf %27 : vector<10x2xf32>
    %cst_8 = arith.constant 0.000000e+00 : f32
    %32 = vector.broadcast %cst_8 : f32 to vector<10x2xf32>
    %33 = arith.subf %32, %31 : vector<10x2xf32>
    %34 = math.exp %33 : vector<10x2xf32>
    %35 = math.log1p %34 : vector<10x2xf32>
    %36 = arith.addf %25, %35 : vector<10x2xf32>
    %37 = arith.select %28, %30, %36 : vector<10x2xi1>, vector<10x2xf32>
    %38 = tpu.concatenate %9, %37, %9 in 0 : vector<2x2xf32>, vector<10x2xf32>, vector<2x2xf32> -> vector<14x2xf32>
    %39 = vector.extract_strided_slice %38 {offsets = [2, 0], sizes = [12, 2], strides = [1, 1]} : vector<14x2xf32> to vector<12x2xf32>
    %40 = vector.broadcast %4 : f32 to vector<12x2xf32>
    %41 = arith.mulf %40, %39 : vector<12x2xf32>
    %42 = vector.extract_strided_slice %38 {offsets = [1, 0], sizes = [12, 2], strides = [1, 1]} : vector<14x2xf32> to vector<12x2xf32>
    %43 = vector.broadcast %5 : f32 to vector<12x2xf32>
    %44 = arith.mulf %43, %42 : vector<12x2xf32>
    %45 = arith.addf %41, %44 : vector<12x2xf32>
    %46 = vector.extract_strided_slice %38 {offsets = [0, 0], sizes = [12, 2], strides = [1, 1]} : vector<14x2xf32> to vector<12x2xf32>
    %47 = vector.broadcast %6 : f32 to vector<12x2xf32>
    %48 = arith.mulf %47, %46 : vector<12x2xf32>
    %49 = arith.addf %45, %48 : vector<12x2xf32>
    %50 = vector.broadcast %7 : f32 to vector<12x2xf32>
    %51 = arith.addf %49, %50 : vector<12x2xf32>
    %c0_9 = arith.constant 0 : index
    %c0_10 = arith.constant 0 : index
    %52 = vector.load %arg6[%c0_9, %c0_10] : memref<12x2xf32, #tpu.memory_space<vmem>>, vector<12x2xf32>
    tpu.vector_store %arg6[%c0_9, %c0_10], %51 {strides = array<i32>} : memref<12x2xf32, #tpu.memory_space<vmem>>, vector<12x2xf32>,
    return
  }
  func.func @transform_0(%arg0: i32) -> i32 {
    %c0_i32 = arith.constant 0 : i32
    %c0_i32_0 = arith.constant 0 : i32
    return %c0_i32 : i32
  }
  func.func @transform_1(%arg0: i32) -> i32 {
    %c0_i32 = arith.constant 0 : i32
    %c0_i32_0 = arith.constant 0 : i32
    return %c0_i32 : i32
  }
  func.func @transform_2(%arg0: i32) -> i32 {
    %c0_i32 = arith.constant 0 : i32
    %c0_i32_0 = arith.constant 0 : i32
    return %c0_i32 : i32
  }
  func.func @transform_3(%arg0: i32) -> i32 {
    %c0_i32 = arith.constant 0 : i32
    %c0_i32_0 = arith.constant 0 : i32
    return %c0_i32 : i32
  }
  func.func @transform_4(%arg0: i32) -> (i32, i32) {
    %c0_i32 = arith.constant 0 : i32
    %c0_i32_0 = arith.constant 0 : i32
    return %c0_i32, %arg0 : i32, i32
  }
  func.func @transform_5(%arg0: i32) -> (i32, i32) {
    %c0_i32 = arith.constant 0 : i32
    %c0_i32_0 = arith.constant 0 : i32
    return %c0_i32, %arg0 : i32, i32
  }
}

</mosaic_0001>

<bundles_post_ra>
// kernel: tpu_custom_call.1
= control target key start
LH: loop header
LB: loop body
LE: loop exit
PB: predicated region body
PF: predicated region fallthrough
CT: control target
= control target key end

     0   :  { %12 = vsyncpa [#allocation5], 0  ;;  %s280_s0 = inlined_call_operand.vmem [shape: f32[3], index: 0, kind: input, shape index: {}]   ;;  %s281_s1 = inlined_call_operand.<no memory space> [shape: f32[1], index: 1, kind: input, shape index: {}]   ;;  %s282_s2 = inlined_call_operand.vmem [shape: f32[3], index: 2, kind: input, shape index: {}]   ;;  %s283_s3 = inlined_call_operand.<no memory space> [shape: f32[1], index: 3, kind: input, shape index: {}]   ;;  %s284_s4 = inlined_call_operand.vmem [shape: f32[8,2], index: 4, kind: input, shape index: {}]   ;;  %s285_s5 = inlined_call_operand.vmem [shape: f32[12,2], index: 5, kind: output, shape index: {}]  }
   0x1   :  { %s19_s20 = sshll.u32 %s280_s0, 4  ;;  %s20_s20 = int_to_ptr.vmem [resolvable:$true] %s19_s20 }
   0x2   :  { %13 = vsyncpa [#allocation7], 0  ;;  %s30_s23 = sshll.u32 %s282_s2, 4  ;;  %s214_s24 = smov [#allocation4]   ;;  %s31_s23 = int_to_ptr.vmem [resolvable:$true] %s30_s23 }
   0x3   :  { %22 = dma.vmem_to_smem %s20_s20, 16, %s214_s24, [#allocation5]  }
   0x4   :  { %s215_s25 = smov [#allocation6]  }
   0x5   :  { %33 = dma.vmem_to_smem %s31_s23, 16, %s215_s25, [#allocation7]  }
   0x6   :  { %210 = dma.done.wait [#allocation5], 16  }
   0x7   :  { %211 = vsyncadd [#allocation5], 4294967280 }
   0x8   :  { %212 = dma.done.wait [#allocation7], 16  }
   0x9   :  { %213 = vsyncadd [#allocation7], 4294967280 }
   0xa   :  { %46 = sfence }
   0xb   :  { %s47_s26 = sld [smem:[#allocation4]]  ;;  %v55_v0 = vld [vmem:[%s284_s4] sm:$0xff]  ;;  %vm59_vm0 = vcmask 1041408   ;;  %vm70_vm1 = vcmask 1040384   ;;  %v90_v21 = vstv %s281_s1  ;;  %vm130_vm6 = vcmask 1043456  }
   0xc   :  { %s172_s0 = sld [smem:[#allocation4 + $0x1]]  ;;  %v57_v1 = vrot.slane %v55_v0, 6  ;;  %vm162_vm7 = vcmask 15362   ;;  %vm164_vm8 = vcmask 13312  }
   0xd   :  { %s173_s29 = sld [smem:[#allocation4 + $0x2]] }
   0xe   :  { %v60_v2 = vsel %vm59_vm0, 0.0, %v57_v1  ;;  %v61_v3 = vsel %vm59_vm0, %v57_v1, 0.0  ;;  %s262_s1 = sld [smem:[#allocation6]] }
   0xf   :  { %s264_s30 = sld [smem:[#allocation6 + $0x1]] }
  0x10   :  { %s175_s6 = sld [smem:[#allocation6 + $0x2]] }
  0x11   :  { %v62_v4 = vstv %s47_s26 }
  0x12   :  { %v65_v5 = vstv %s172_s0  ;;  %v63_v6 = vmul.f32 %v62_v4, %v60_v2  ;;  %v64_v10 = vmul.f32 %v62_v4, %v61_v3 }
  0x13   :  { %v66_v7 = vmul.f32 %v65_v5, %v60_v2  ;;  %v67_v8 = vmul.f32 %v65_v5, %v61_v3  ;;  %v78_v9 = vstv %s173_s29 }
  0x14   :  { %v79_v11 = vmul.f32 %v78_v9, %v60_v2  ;;  %v80_v12 = vmul.f32 %v78_v9, %v61_v3  ;;  %v132_v54 = vstv %s262_s1 }
  0x15   :  { %v71_v13 = vrot.slane %v66_v7, 7  ;;  %v72_v14 = vrot.slane %v67_v8, 7  ;;  %v135_v55 = vstv %s264_s30  ;;  %v159_v8 = vstv %s283_s3 }
  0x16   :  { %v83_v15 = vrot.slane %v79_v11, 6  ;;  %v84_v16 = vrot.slane %v80_v12, 6  ;;  %v147_v56 = vstv %s175_s6 }
  0x17   :  { %v73_v17 = vsel %vm70_vm1, %v71_v13, %v72_v14  ;;  %v76_v18 = vadd.f32 %v71_v13, %v63_v6 }
  0x18   :  { %v77_v19 = vadd.f32 %v73_v17, %v64_v10  ;;  %v85_v20 = vsel %vm59_vm0, %v83_v15, %v84_v16 }
  0x19   :  { %v88_v22 = vadd.f32 %v83_v15, %v76_v18 }
  0x1a   :  { %v89_v23 = vadd.f32 %v85_v20, %v77_v19 }
  0x1b   :  { %v91_v24 = vadd.f32 %v90_v21, %v88_v22 }
  0x1c   :  { %v92_v25 = vadd.f32 %v90_v21, %v89_v23 }
  0x1d   :  { %v99_v26 = vand.u32 2147483647, %v91_v24  ;;  %v93_v44 = vmax.f32 %v91_v24, 0.0  ;;  %vm95_vm4 = vcmp.ne.f32.partialorder %v91_v24, %v91_v24 }
  0x1e   :  { %v100_v27 = vand.u32 2147483647, %v92_v25  ;;  %v94_v47 = vmax.f32 %v92_v25, 0.0  ;;  %vm96_vm5 = vcmp.ne.f32.partialorder %v92_v25, %v92_v25 }
  0x1f   :  { %v101_v28 = vsub.f32 0.0, %v99_v26 }
  0x20   :  { %v102_v29 = vsub.f32 0.0, %v100_v27 }
  0x21   :  { %v103_v30 = vmul.f32 1.442695, %v101_v28 }
  0x22   :  { %v105_v31 = vmul.f32 1.442695, %v102_v29 }
  0x23   :  { %178 = vpow2.f32 %v103_v30 }
  0x24   :  { %180 = vpow2.f32 %v105_v31 }
  0x29   :  { %v179_v32 = vpop.eup %178 }
  0x2a   :  { %v181_v33 = vpop.eup %180  ;;  %v107_v34 = vadd.f32 1.0, %v179_v32  ;;  %v110_v35 = vmul.f32 -0.5, %v179_v32  ;;  %v113_v39 = vand.u32 2147483647, %v179_v32 }
  0x2b   :  { %v116_v36 = vadd.f32 1.0, %v181_v33  ;;  %v119_v37 = vmul.f32 -0.5, %v181_v33  ;;  %v122_v41 = vand.u32 2147483647, %v181_v33 }
  0x2c   :  { %182 = vlog2.f32 %v107_v34  ;;  %v111_v38 = vadd.f32 1.0, %v110_v35  ;;  %vm114_vm2 = vcmp.lt.f32.partialorder %v113_v39, 0.0004427343 }
  0x2d   :  { %184 = vlog2.f32 %v116_v36  ;;  %v120_v40 = vadd.f32 1.0, %v119_v37  ;;  %vm123_vm3 = vcmp.lt.f32.partialorder %v122_v41, 0.0004427343 }
  0x2e   :  { %v112_v42 = vmul.f32 %v179_v32, %v111_v38 }
  0x2f   :  { %v121_v45 = vmul.f32 %v181_v33, %v120_v40 }
  0x32   :  { %v183_v43 = vpop.eup %182 }
  0x33   :  { %v185_v46 = vpop.eup %184  ;;  %v109_v48 = vmul.f32 0.6931472, %v183_v43 }
  0x34   :  { %v118_v49 = vmul.f32 0.6931472, %v185_v46 }
  0x35   :  { %v115_v50 = vsel %vm114_vm2, %v112_v42, %v109_v48 }
  0x36   :  { %v124_v51 = vsel %vm123_vm3, %v121_v45, %v118_v49  ;;  %v125_v52 = vadd.f32 %v115_v50, %v93_v44 }
  0x37   :  { %v126_v53 = vadd.f32 %v124_v51, %v94_v47 }
  0x38   :  { %v127_v57 = vsel %vm95_vm4, %v91_v24, %v125_v52 }
  0x39   :  { %v128_v58 = vsel %vm96_vm5, %v92_v25, %v126_v53  ;;  %v129_v59 = vsel %vm59_vm0, 0.0, %v127_v57 }
  0x3a   :  { %v131_v60 = vsel %vm130_vm6, %v128_v58, 0.0  ;;  %v133_v61 = vmul.f32 %v132_v54, %v129_v59  ;;  %v136_v62 = vmul.f32 %v135_v55, %v129_v59  ;;  %v148_v63 = vmul.f32 %v147_v56, %v129_v59 }
  0x3b   :  { %v137_v0 = vmul.f32 %v135_v55, %v131_v60  ;;  %v149_v1 = vmul.f32 %v147_v56, %v131_v60  ;;  %v134_v4 = vmul.f32 %v132_v54, %v131_v60 }
  0x3c   :  { %v140_v2 = vrot.slane %v136_v62, 7  ;;  %v152_v3 = vrot.slane %v148_v63, 6 }
  0x3d   :  { %v141_v5 = vrot.slane %v137_v0, 7  ;;  %v153_v6 = vrot.slane %v149_v1, 6 }
  0x3e   :  { %v145_v7 = vadd.f32 %v140_v2, %v133_v61 }
  0x3f   :  { %v142_v9 = vsel %vm70_vm1, %v140_v2, %v141_v5  ;;  %v154_v10 = vsel %vm59_vm0, %v152_v3, %v153_v6 }
  0x40   :  { %v157_v11 = vadd.f32 %v152_v3, %v145_v7  ;;  %v146_v12 = vadd.f32 %v142_v9, %v134_v4 }
  0x42   :  { %v160_v13 = vadd.f32 %v159_v8, %v157_v11  ;;  %v158_v14 = vadd.f32 %v154_v10, %v146_v12 }
  0x44   :  { %163 = vst.msk [vmem:[%s285_s5 - $0x2] sm:$0xfc] %vm162_vm7, %v160_v13  ;;  %v161_v15 = vadd.f32 %v159_v8, %v158_v14 }
  0x46   :  { %165 = vst.msk [vmem:[%s285_s5 + $0x6] sm:$0x3f] %vm164_vm8, %v161_v15 }
  0x47   :  { %170 = vsyncpa [#allocation5], 1 }
  0x48   :  { %171 = vsyncpa [#allocation7], 1 }

</bundles_post_ra>
